<compile_context>
chip_gen: v7x
topology: tpu7x:2x2x1
jax: 0.10.0
libtpu: 0.0.40
codegen_flags: <defaults>
</compile_context>

<pallas_src>
import jax
import jax.numpy as jnp
from jax import lax
from jax.experimental import pallas as pl
from jax.experimental.pallas import tpu as pltpu

_LANE_TILE = 128  # batch elements per grid step (lane axis)


def _transform_kernel(theta_ref, tx_ref, ty_ref, u_ref, out_ref):
    """Builds `nlanes` 4x4 transforms, flattened row-major along the sublane axis.

    theta_ref/tx_ref/ty_ref : (1,) f32 scalars in SMEM
    u_ref                   : (8, nlanes) f32 uniforms in [0, 1); rows 0/1 used
    out_ref                 : (16, nlanes) f32; row k is entry (k//4, k%4)
    """
    nlanes = out_ref.shape[1]
    f32 = jnp.float32

    # ---- angle -> radians; one cos/sin EUP pass over a single (1, n) row ----
    radian = theta_ref[0] * (3.141592 / 180.0)
    rad_row = jnp.full((1, nlanes), radian, dtype=f32)
    cos_b = jnp.broadcast_to(jnp.cos(rad_row), (16, nlanes))
    sin_b = jnp.broadcast_to(jnp.sin(rad_row), (16, nlanes))

    # ---- dx ~ U(-t_x, t_x), dy ~ U(-t_y, t_y), one value per batch lane -----
    u = u_ref[...]  # (8, nlanes)
    dx_b = jnp.broadcast_to((2.0 * u[0:1, :] - 1.0) * tx_ref[0], (16, nlanes))
    dy_b = jnp.broadcast_to((2.0 * u[1:2, :] - 1.0) * ty_ref[0], (16, nlanes))

    # ---- assemble via constant selector matrices + multiply-adds ------------
    # flattened entry index k = 4*i + j along the sublane axis
    idx = lax.broadcasted_iota(jnp.int32, (16, nlanes), 0)
    sel_cos = ((idx == 0) | (idx == 5)).astype(f32)            # M00, M11
    sel_sin = (idx == 4).astype(f32) - (idx == 1).astype(f32)  # +M10, -M01
    sel_dx = (idx == 3).astype(f32)                            # M03
    sel_dy = (idx == 7).astype(f32)                            # M13
    base = ((idx == 10) | (idx == 15)).astype(f32)             # M22 = M33 = 1

    out_ref[...] = (base
                    + cos_b * sel_cos
                    + sin_b * sel_sin
                    + dx_b * sel_dx
                    + dy_b * sel_dy)


def make_transformation_M_batched(r_theta, t_x, t_y, key, batch,
                                  *, lane_tile=_LANE_TILE):
    """Returns (batch, 4, 4) f32 transforms; each matrix gets fresh dx/dy draws."""
    b_pad = ((batch + lane_tile - 1) // lane_tile) * lane_tile
    b_pad = max(b_pad, lane_tile)

    theta = jnp.asarray([r_theta], dtype=jnp.float32)
    tx = jnp.asarray([t_x], dtype=jnp.float32)
    ty = jnp.asarray([t_y], dtype=jnp.float32)
    # Uniform [0,1) draws; rows 0/1 carry the dx/dy uniforms, rows 2-7 pad the
    # sublane tile so the input block is a clean (8, 128) tile.
    u = jax.random.uniform(key, (8, b_pad), dtype=jnp.float32)

    out = pl.pallas_call(
        _transform_kernel,
        out_shape=jax.ShapeDtypeStruct((16, b_pad), jnp.float32),
        grid=(b_pad // lane_tile,),
        in_specs=[
            pl.BlockSpec(memory_space=pltpu.MemorySpace.SMEM),   # theta
            pl.BlockSpec(memory_space=pltpu.MemorySpace.SMEM),   # t_x
            pl.BlockSpec(memory_space=pltpu.MemorySpace.SMEM),   # t_y
            pl.BlockSpec((8, lane_tile), lambda i: (0, i)),      # uniforms
        ],
        out_specs=pl.BlockSpec((16, lane_tile), lambda i: (0, i)),
        compiler_params=pltpu.CompilerParams(
            dimension_semantics=("parallel",)),
    )(theta, tx, ty, u)

    # lane-dense (16, B) slab -> (batch, 4, 4); layout plumbing in the wrapper.
    return out[:, :batch].T.reshape(batch, 4, 4)


def make_transformation_M(r_theta, t_x, t_y, key=None):
    """Single-matrix convenience wrapper (same semantics as the torch module).

    NOTE: a single 4x4 build is dispatch-overhead bound; prefer the batched
    entry point for repeated calls (data augmentation).
    """
    if key is None:
        key = jax.random.PRNGKey(0)
    return make_transformation_M_batched(r_theta, t_x, t_y, key, 1)[0]


if __name__ == "__main__":
    import math
    import numpy as np

    # Deterministic example inputs derived from PRNGKey(0).
    key = jax.random.PRNGKey(0)
    k1, k2, k3, k_rand = jax.random.split(key, 4)
    r_theta = float(jax.random.uniform(k1, (), minval=-180.0, maxval=180.0))
    t_x = float(jax.random.uniform(k2, (), minval=0.5, maxval=5.0))
    t_y = float(jax.random.uniform(k3, (), minval=0.5, maxval=5.0))

    # ---- batched path: 256 matrices (2 grid steps of 128 lanes) -------------
    batch = 256
    M = make_transformation_M_batched(r_theta, t_x, t_y, k_rand, batch)
    M = jax.block_until_ready(M)
    M_np = np.asarray(jax.device_get(M))
    assert M_np.shape == (batch, 4, 4)

    # Reference for all deterministic entries.
    rad = r_theta * 3.141592 / 180.0
    c, s = math.cos(rad), math.sin(rad)
    ref = np.zeros((4, 4), np.float32)
    ref[0, 0] = c; ref[0, 1] = -s
    ref[1, 0] = s; ref[1, 1] = c
    ref[2, 2] = 1.0; ref[3, 3] = 1.0

    det_mask = np.ones((4, 4), bool)
    det_mask[0, 3] = False  # dx
    det_mask[1, 3] = False  # dy
    assert np.allclose(M_np[:, det_mask], ref[det_mask][None, :], atol=1e-5)

    # Random translations stay inside their ranges and actually vary.
    dx = M_np[:, 0, 3]
    dy = M_np[:, 1, 3]
    assert np.all(np.abs(dx) <= t_x + 1e-5)
    assert np.all(np.abs(dy) <= t_y + 1e-5)
    assert np.std(dx) > 0.0 and np.std(dy) > 0.0

    # ---- single-matrix path --------------------------------------------------
    M1 = jax.block_until_ready(make_transformation_M(r_theta, t_x, t_y, k_rand))
    M1_np = np.asarray(jax.device_get(M1))
    assert M1_np.shape == (4, 4)
    assert np.allclose(M1_np[det_mask], ref[det_mask], atol=1e-5)
    assert abs(M1_np[0, 3]) <= t_x + 1e-5 and abs(M1_np[1, 3]) <= t_y + 1e-5

    print("KERNEL_OK")
</pallas_src>

<mosaic_0001>
module attributes {stable_mosaic.version = 11 : i64} {
  func.func @_transform_kernel(%arg0: i32, %arg1: memref<1xf32, #tpu.memory_space<smem>>, %arg2: memref<1xf32, #tpu.memory_space<smem>>, %arg3: memref<1xf32, #tpu.memory_space<smem>>, %arg4: memref<8x128xf32, #tpu.memory_space<vmem>>, %arg5: memref<16x128xf32, #tpu.memory_space<vmem>>) attributes {dimension_semantics = [#tpu.dimension_semantics<parallel>], iteration_bounds = array<i64: 2>, scalar_prefetch = 0 : i64, scratch_operands = 0 : i64, tpu.core_type = #tpu.core_type<tc>, window_params = [{transform_indices = @transform_0, window_bounds = array<i64: 1>}, {transform_indices = @transform_1, window_bounds = array<i64: 1>}, {transform_indices = @transform_2, window_bounds = array<i64: 1>}, {transform_indices = @transform_3, window_bounds = array<i64: 8, 128>}, {transform_indices = @transform_4, window_bounds = array<i64: 16, 128>}]} {
    %c0 = arith.constant 0 : index
    %0 = memref.load %arg1[%c0] : memref<1xf32, #tpu.memory_space<smem>>
    %cst = arith.constant 0.0174532887 : f32
    %1 = arith.mulf %0, %cst : f32
    %2 = vector.broadcast %1 : f32 to vector<1x128xf32>
    %3 = math.cos %2 : vector<1x128xf32>
    %4 = vector.shape_cast %3 : vector<1x128xf32> to vector<1x128xf32>
    %5 = vector.broadcast %4 : vector<1x128xf32> to vector<16x128xf32>
    %6 = math.sin %2 : vector<1x128xf32>
    %7 = vector.shape_cast %6 : vector<1x128xf32> to vector<1x128xf32>
    %8 = vector.broadcast %7 : vector<1x128xf32> to vector<16x128xf32>
    %c0_0 = arith.constant 0 : index
    %c0_1 = arith.constant 0 : index
    %9 = vector.load %arg4[%c0_0, %c0_1] : memref<8x128xf32, #tpu.memory_space<vmem>>, vector<8x128xf32>
    %10 = vector.extract_strided_slice %9 {offsets = [0, 0], sizes = [1, 128], strides = [1, 1]} : vector<8x128xf32> to vector<1x128xf32>
    %cst_2 = arith.constant 2.000000e+00 : f32
    %11 = vector.broadcast %cst_2 : f32 to vector<1x128xf32>
    %12 = arith.mulf %11, %10 : vector<1x128xf32>
    %cst_3 = arith.constant 1.000000e+00 : f32
    %13 = vector.broadcast %cst_3 : f32 to vector<1x128xf32>
    %14 = arith.subf %12, %13 : vector<1x128xf32>
    %c0_4 = arith.constant 0 : index
    %15 = memref.load %arg2[%c0_4] : memref<1xf32, #tpu.memory_space<smem>>
    %16 = vector.broadcast %15 : f32 to vector<1x128xf32>
    %17 = arith.mulf %14, %16 : vector<1x128xf32>
    %18 = vector.shape_cast %17 : vector<1x128xf32> to vector<1x128xf32>
    %19 = vector.broadcast %18 : vector<1x128xf32> to vector<16x128xf32>
    %20 = vector.extract_strided_slice %9 {offsets = [1, 0], sizes = [1, 128], strides = [1, 1]} : vector<8x128xf32> to vector<1x128xf32>
    %cst_5 = arith.constant 2.000000e+00 : f32
    %21 = vector.broadcast %cst_5 : f32 to vector<1x128xf32>
    %22 = arith.mulf %21, %20 : vector<1x128xf32>
    %cst_6 = arith.constant 1.000000e+00 : f32
    %23 = vector.broadcast %cst_6 : f32 to vector<1x128xf32>
    %24 = arith.subf %22, %23 : vector<1x128xf32>
    %c0_7 = arith.constant 0 : index
    %25 = memref.load %arg3[%c0_7] : memref<1xf32, #tpu.memory_space<smem>>
    %26 = vector.broadcast %25 : f32 to vector<1x128xf32>
    %27 = arith.mulf %24, %26 : vector<1x128xf32>
    %28 = vector.shape_cast %27 : vector<1x128xf32> to vector<1x128xf32>
    %29 = vector.broadcast %28 : vector<1x128xf32> to vector<16x128xf32>
    %30 = tpu.iota {dimensions = array<i32: 0>} : vector<16x128xi32>
    %c0_i32 = arith.constant 0 : i32
    %31 = vector.broadcast %c0_i32 : i32 to vector<16x128xi32>
    %32 = arith.cmpi eq, %30, %31 : vector<16x128xi32>
    %c5_i32 = arith.constant 5 : i32
    %33 = vector.broadcast %c5_i32 : i32 to vector<16x128xi32>
    %34 = arith.cmpi eq, %30, %33 : vector<16x128xi32>
    %35 = arith.ori %32, %34 : vector<16x128xi1>
    %36 = arith.extui %35 : vector<16x128xi1> to vector<16x128xi32>
    %37 = arith.sitofp %36 : vector<16x128xi32> to vector<16x128xf32>
    %c4_i32 = arith.constant 4 : i32
    %38 = vector.broadcast %c4_i32 : i32 to vector<16x128xi32>
    %39 = arith.cmpi eq, %30, %38 : vector<16x128xi32>
    %40 = arith.extui %39 : vector<16x128xi1> to vector<16x128xi32>
    %41 = arith.sitofp %40 : vector<16x128xi32> to vector<16x128xf32>
    %c1_i32 = arith.constant 1 : i32
    %42 = vector.broadcast %c1_i32 : i32 to vector<16x128xi32>
    %43 = arith.cmpi eq, %30, %42 : vector<16x128xi32>
    %44 = arith.extui %43 : vector<16x128xi1> to vector<16x128xi32>
    %45 = arith.sitofp %44 : vector<16x128xi32> to vector<16x128xf32>
    %46 = arith.subf %41, %45 : vector<16x128xf32>
    %c3_i32 = arith.constant 3 : i32
    %47 = vector.broadcast %c3_i32 : i32 to vector<16x128xi32>
    %48 = arith.cmpi eq, %30, %47 : vector<16x128xi32>
    %49 = arith.extui %48 : vector<16x128xi1> to vector<16x128xi32>
    %50 = arith.sitofp %49 : vector<16x128xi32> to vector<16x128xf32>
    %c7_i32 = arith.constant 7 : i32
    %51 = vector.broadcast %c7_i32 : i32 to vector<16x128xi32>
    %52 = arith.cmpi eq, %30, %51 : vector<16x128xi32>
    %53 = arith.extui %52 : vector<16x128xi1> to vector<16x128xi32>
    %54 = arith.sitofp %53 : vector<16x128xi32> to vector<16x128xf32>
    %c10_i32 = arith.constant 10 : i32
    %55 = vector.broadcast %c10_i32 : i32 to vector<16x128xi32>
    %56 = arith.cmpi eq, %30, %55 : vector<16x128xi32>
    %c15_i32 = arith.constant 15 : i32
    %57 = vector.broadcast %c15_i32 : i32 to vector<16x128xi32>
    %58 = arith.cmpi eq, %30, %57 : vector<16x128xi32>
    %59 = arith.ori %56, %58 : vector<16x128xi1>
    %60 = arith.extui %59 : vector<16x128xi1> to vector<16x128xi32>
    %61 = arith.sitofp %60 : vector<16x128xi32> to vector<16x128xf32>
    %62 = arith.mulf %5, %37 : vector<16x128xf32>
    %63 = arith.addf %61, %62 : vector<16x128xf32>
    %64 = arith.mulf %8, %46 : vector<16x128xf32>
    %65 = arith.addf %63, %64 : vector<16x128xf32>
    %66 = arith.mulf %19, %50 : vector<16x128xf32>
    %67 = arith.addf %65, %66 : vector<16x128xf32>
    %68 = arith.mulf %29, %54 : vector<16x128xf32>
    %69 = arith.addf %67, %68 : vector<16x128xf32>
    %c0_8 = arith.constant 0 : index
    %c0_9 = arith.constant 0 : index
    %70 = vector.load %arg5[%c0_8, %c0_9] : memref<16x128xf32, #tpu.memory_space<vmem>>, vector<16x128xf32>
    tpu.vector_store %arg5[%c0_8, %c0_9], %69 {strides = array<i32>} : memref<16x128xf32, #tpu.memory_space<vmem>>, vector<16x128xf32>,
    return
  }
  func.func @transform_0(%arg0: i32) -> i32 {
    %c0_i32 = arith.constant 0 : i32
    %c0_i32_0 = arith.constant 0 : i32
    return %c0_i32 : i32
  }
  func.func @transform_1(%arg0: i32) -> i32 {
    %c0_i32 = arith.constant 0 : i32
    %c0_i32_0 = arith.constant 0 : i32
    return %c0_i32 : i32
  }
  func.func @transform_2(%arg0: i32) -> i32 {
    %c0_i32 = arith.constant 0 : i32
    %c0_i32_0 = arith.constant 0 : i32
    return %c0_i32 : i32
  }
  func.func @transform_3(%arg0: i32) -> (i32, i32) {
    %c0_i32 = arith.constant 0 : i32
    %c0_i32_0 = arith.constant 0 : i32
    return %c0_i32, %arg0 : i32, i32
  }
  func.func @transform_4(%arg0: i32) -> (i32, i32) {
    %c0_i32 = arith.constant 0 : i32
    %c0_i32_0 = arith.constant 0 : i32
    return %c0_i32, %arg0 : i32, i32
  }
}

</mosaic_0001>

<bundles_post_ra>
// kernel: tpu_custom_call.1
= control target key start
LH: loop header
LB: loop body
LE: loop exit
PB: predicated region body
PF: predicated region fallthrough
CT: control target
= control target key end

     0   :  { %s1028_s0 = inlined_call_operand.<no memory space> [shape: f32[1], index: 0, kind: input, shape index: {}]   ;;  %s1029_s1 = inlined_call_operand.<no memory space> [shape: f32[1], index: 1, kind: input, shape index: {}]   ;;  %s1030_s2 = inlined_call_operand.<no memory space> [shape: f32[1], index: 2, kind: input, shape index: {}]   ;;  %s1031_s3 = inlined_call_operand.hbm [shape: f32[8,256], index: 3, kind: input, shape index: {}]   ;;  %s1032_s4 = inlined_call_operand.hbm [shape: f32[16,256], index: 4, kind: output, shape index: {}]  }
   0x1   :  { %9 = sst [smem:[#allocation2]] %s1028_s0 }
   0x2   :  { %10 = sst [smem:[#allocation3]] %s1029_s1 }
   0x3   :  { %11 = sst [smem:[#allocation4]] %s1030_s2 }
   0x4   :  { %12 = vsyncpa [#allocation6], 0 }
   0x5   :  { %14 = vsyncpa [#allocation6 + $0x1], 0 }
   0x6   :  { %15 = vsyncpa [#allocation7], 0 }
   0x7   :  { %17 = vsyncpa [#allocation7 + $0x1], 0  ;;  %s831_s21 = smov 0   ;;  %s833_s22 = smov 0  }
   0x8   :  { %s835_s23 = smov 0   ;;  %s837_s24 = smov 0  }
   0x9 LB: > { %s852_s0 = sadd.s32 4294967295, %s783_s24   ;;  %s596_s1 = sadd.s32 4294967294, %s783_s24   ;;  %s783_s24 = sphi %s837_s24, %s1047_s24   ;;  %s779_s23 = sphi %s835_s23, %s1046_s23   ;;  %s775_s22 = sphi %s833_s22, %s1045_s22   ;;  %s771_s21 = sphi %s831_s21, %s1044_s21  }
   0xa   : > { %s856_s2 = sadd.s32 1, %s783_s24   ;;  %s93_s25 = sadd.s32 1, %s779_s23 }
   0xb   : > { %s90_s26 = ssub.s32 %s783_s24, %s856_s2  ;;  %p100_p0 = scmp.ne.s32.totalorder %s779_s23, %s775_s22 }
   0xc   : > { %p91_p1 = scmp.eq.s32.totalorder %s90_s26, 0  ;;  %p101_p2 = scmp.eq.s32.totalorder %s783_s24, 0 }
   0xd   : > { %p106_p3 = scmp.ne.s32.totalorder %s775_s22, %s771_s21  ;;  %p107_p4 = scmp.eq.s32.totalorder %s852_s0, 0 }
   0xe   : > { %s868_s27 = scalar_select %p91_p1, %s779_s23, %s93_s25  }
   0xf   : > { %p870_p5 = por %p101_p2, %p100_p0  ;;  %p874_p6 = por %p107_p4, %p106_p3 }
  0x10   : > { %p130_p7 = scmp.eq.s32.totalorder %s852_s0, 1  ;;  %p136_p8 = scmp.eq.s32.totalorder %s596_s1, 1 }
  0x11   : > { %p639_p10 = scmp.lt.s32.totalorder %s783_s24, 2  ;;  %s165_s6 = sand.u32 1, %s779_s23  }
  0x12   : > { %p881_p11 = por %p130_p7, %p100_p0  ;;  %p885_p12 = por %p136_p8, %p106_p3 }
  0x13   : > { %s600_s7 = sshll.u32 %s783_s24, 7  ;;  %s599_s8 = sshll.u32 %s165_s6, 3 }
  0x14   : > { %s1036_s30 = scalar_select %p881_p11, 1, 0 }
  0x15   : > { %s1037_s5 = scalar_select %p885_p12, 1, 0 }
  0x16   : > { %s894_s11 = scalar_lea.hbm %s1031_s3, %s600_s7  ;;  %s169_s12 = scalar_lea.vmem [#allocation5], %s599_s8 }
  0x17   : > { %s176_s13 = sshll.u32 %s169_s12, 4  ;;  %p898_p13 = pnand %p639_p10, %p870_p5  ;;  %s902_s13 = int_to_ptr.vmem [resolvable:$true] %s176_s13 }
  0x18   : > { %s166_s15 = scalar_lea.sflag [#allocation6], %s165_s6  ;;  %s687_s16 = scalar_lea.hbm %s894_s11, 128 }
  0x19   : > { %p688_p2 = scmp.ne.s32.totalorder %s894_s11, %s687_s16  ;;  %p689_p3 = pneg %p898_p13 }
  0x1a   : > { %s692_s19 = scalar_lea.hbm %s1031_s3, 256  ;;  %p693_p5 = scmp.lt.u32.totalorder %s894_s11, %s1031_s3 }
  0x1b   : > { %p690_p4 = pnand %p689_p3, %p688_p2  ;;  %p694_p8 = scmp.lt.u32.totalorder %s692_s19, %s687_s16 }
  0x1c   : > { %p696_p9 = scmp.lt.u32.totalorder %s687_s16, %s894_s11 }
  0x1d   : > { %p691_p7 = pneg %p690_p4  ;;  %p695_p10 = por %p694_p8, %p693_p5 }
  0x1f   : > { %p697_p0 = por %p696_p9, %p695_p10 }
  0x21   : > { %p698_p1 = pnand %p697_p0, %p691_p7 }
  0x23   : > { %701 = shalt.err (!%p698_p1)
}
  0x24   : > { %s702_s25 = scalar_lea.vmem %s902_s13, 128  ;;  %s785_s26 = smov [#allocation5]  }
  0x25   : > { %p703_p2 = scmp.ne.s32.totalorder %s902_s13, %s702_s25  ;;  %s707_s28 = sshll.u32 %s785_s26, 4  ;;  %s708_s28 = int_to_ptr.vmem [resolvable:$false] %s707_s28 }
  0x26   : > { %s709_s6 = scalar_lea.vmem %s708_s28, 256  ;;  %p710_p11 = scmp.lt.s32.totalorder %s902_s13, %s708_s28 }
  0x27   : > { %p705_p4 = pnand %p703_p2, %p689_p3  ;;  %p711_p5 = scmp.lt.s32.totalorder %s709_s6, %s702_s25 }
  0x29   : > { %p706_p12 = pneg %p705_p4  ;;  %p712_p8 = por %p711_p5, %p710_p11 }
  0x2b   : > { %p713_p9 = pnand %p712_p8, %p706_p12 }
  0x2d   : > { %716 = shalt.err (!%p713_p9)
}
  0x2e   : > { %634 = dma.hbm_to_vmem [thread:$0]  (!%p898_p13), %s894_s11, 128, %s902_s13, %s166_s15  }
  0x2f   : > { %p1039_p0 = scmp.lt.s32.totalorder %s783_s24, 3  ;;  %p1040_p1 = scmp.ge.s32.totalorder %s783_s24, 1 }
  0x31   : > { %p182_p3 = pnand %p1040_p1, %p1039_p0 }
  0x32   : > { %s936_s7 = sand.u32 (!%p182_p3), 1, %s775_s22  }
  0x33   : > { %185 = sbr.rel (%p182_p3) target bundleno = 174 (0xae), region = 36  ;;  %s602_s8 = sshll.u32 (!%p182_p3), %s936_s7, 3 }
  0x34   : > { %s188_s9 = scalar_lea.sflag (!%p182_p3), [#allocation6], %s936_s7  ;;  %s940_s10 = scalar_lea.vmem (!%p182_p3), [#allocation5], %s602_s8 }
  0x3a   : > { %762 = dma.done.wait (%p874_p6), %s188_s9, 128  }
  0x3b   : > { %764 = vsyncadd (%p874_p6), %s188_s9, 4294967168  ;;  %s216_s11 = sld [smem:[#allocation2]]  ;;  %v786_v12 = vmov 683565275   ;;  %v787_v14 = vmov 2475754826  }
  0x3c   : > { %v788_v16 = vmov 2131351028   ;;  %v789_v18 = vmov 2102212464   ;;  %v790_v20 = vmov 920167782  }
  0x3d   : > { %v791_v27 = vmov 1326507024   ;;  %s429_s29 = sld [smem:[#allocation3]]  ;;  %s603_s14 = sshll.u32 %s936_s7, 4 }
  0x3e   : > { %s967_s13 = sld [smem:[#allocation4]]  ;;  %s215_s15 = scalar_lea.vmem [#allocation8], %s603_s14 }
  0x3f   : > { %s523_s16 = sshll.u32 %s215_s15, 4  ;;  %s620_s17 = sshll.u32 %s852_s0, 7  ;;  %s979_s16 = int_to_ptr.vmem [resolvable:$true] %s523_s16 }
  0x40   : > { %s984_s20 = scalar_lea.hbm %s1032_s4, %s620_s17  ;;  %s511_s1 = scalar_lea.sflag [#allocation7], %s936_s7 }
  0x41   : > { %s217_s12 = smul.f32 0.017453289, %s216_s11  ;;  %s717_s25 = scalar_lea.vmem %s979_s16, 256 }
  0x42   : > { %p718_p6 = scmp.ne.s32.totalorder %s979_s16, %s717_s25  ;;  %p1041_p11 = scmp.ne.s32.totalorder %s1036_s30, 0 }
  0x43   : > { %v946_v0 = vstv %s217_s12  ;;  %s793_s0 = smov [#allocation8]  }
  0x44   : > { %v222_v1 = vand.u32 2139095040, %v946_v0  ;;  %v219_v3 = vand.u32 2147483647, %v946_v0  ;;  %vm221_vm7 = vcmp.lt.s32.totalorder %v946_v0, 0  ;;  %p719_p12 = pnand %p718_p6, %p1041_p11  ;;  %s721_s26 = sshll.u32 %s793_s0, 4  ;;  %s722_s26 = int_to_ptr.vmem [resolvable:$false] %s721_s26 }
  0x45   : > { %s723_s28 = scalar_lea.vmem %s722_s26, 512  ;;  %p724_p7 = scmp.lt.s32.totalorder %s979_s16, %s722_s26 }
  0x46   : > { %v223_v2 = vshrl.u32 %v222_v1, 23  ;;  %v226_v6 = vand.u32 8388607, %v219_v3  ;;  %vm220_vm8 = vcmp.le.f32.partialorder %v219_v3, 0.7853982  ;;  %v430_v3 = vstv %s429_s29  ;;  %p720_p13 = pneg %p719_p12  ;;  %p725_p10 = scmp.lt.s32.totalorder %s723_s28, %s717_s25 }
  0x48   : > { %v604_v4 = vadd.s32 4294967169, %v223_v2  ;;  %v227_v9 = vor.u32 8388608, %v226_v6  ;;  %p726_p2 = por %p725_p10, %p724_p7 }
  0x4a   : > { %v229_v5 = vadd.s32 1, %v604_v4  ;;  %v267_v29 = vshll.u32 %v227_v9, 8  ;;  %p727_p4 = pnand %p726_p2, %p720_p13 }
  0x4c   : > { %vm230_vm0 = vcmp.gt.s32.totalorder %v229_v5, 0 }
  0x4d   : > { %v231_v7 = vsel %vm230_vm0, %v229_v5, 0 }
  0x4e   : > { %v233_v8 = vand.u32 31, %v231_v7  ;;  %v232_v10 = vshrl.u32 %v231_v7, 5 }
  0x50   : > { %v234_v11 = vsub.s32 32, %v233_v8  ;;  %v236_v13 = vshll.u32 %v786_v12, %v233_v8  ;;  %v239_v15 = vshll.u32 %v787_v14, %v233_v8  ;;  %v242_v17 = vshll.u32 %v788_v16, %v233_v8 }
  0x51   : > { %v245_v19 = vshll.u32 %v789_v18, %v233_v8  ;;  %v248_v21 = vshll.u32 %v790_v20, %v233_v8  ;;  %vm251_vm1 = vcmp.lt.s32.totalorder %v232_v10, 1  ;;  %vm254_vm2 = vcmp.lt.s32.totalorder %v232_v10, 4 }
  0x52   : > { %v235_v22 = vshrl.u32 %v786_v12, %v234_v11  ;;  %v237_v23 = vshrl.u32 %v787_v14, %v234_v11  ;;  %v240_v24 = vshrl.u32 %v788_v16, %v234_v11  ;;  %v243_v25 = vshrl.u32 %v789_v18, %v234_v11  ;;  %v426_v18 = vld [vmem:[%s940_s10] sm:$0xff] }
  0x53   : > { %v246_v26 = vshrl.u32 %v790_v20, %v234_v11  ;;  %v249_v28 = vshrl.u32 %v791_v27, %v234_v11  ;;  %vm252_vm3 = vcmp.lt.s32.totalorder %v232_v10, 2  ;;  %vm253_vm4 = vcmp.lt.s32.totalorder %v232_v10, 3 }
  0x54   : > { %v238_v30 = vor.u32 %v237_v23, %v236_v13  ;;  %v241_v31 = vor.u32 %v240_v24, %v239_v15  ;;  %v244_v32 = vor.u32 %v243_v25, %v242_v17  ;;  %v432_v15 = vlaneseq }
  0x55   : > { %v247_v33 = vor.u32 %v246_v26, %v245_v19  ;;  %v250_v34 = vor.u32 %v249_v28, %v248_v21  ;;  %v427_v23 = vmul.f32 2.0, %v426_v18  ;;  %v792_v26 = vmov 0.0  }
  0x56   : > { %v255_v35 = vsel %vm251_vm1, %v235_v22, %v238_v30  ;;  %v256_v36 = vsel %vm254_vm2, %v244_v32, 2102212464  ;;  %v259_v37 = vsel %vm251_vm1, %v238_v30, %v241_v31  ;;  %v263_v38 = vsel %vm251_vm1, %v241_v31, %v244_v32 }
  0x57   : > { %v257_v39 = vsel %vm253_vm4, %v241_v31, %v256_v36  ;;  %v260_v40 = vsel %vm254_vm2, %v247_v33, 920167782  ;;  %v264_v41 = vsel %vm254_vm2, %v250_v34, 1326507024  ;;  %v433_v20 = vshrl.u32 %v432_v15, 7 }
  0x58   : > { %v261_v42 = vsel %vm253_vm4, %v244_v32, %v260_v40  ;;  %v265_v43 = vsel %vm253_vm4, %v247_v33, %v264_v41  ;;  %v258_v44 = vsel %vm252_vm3, %v255_v35, %v257_v39  ;;  %v612_v25 = vadd.f32 -1.0, %v427_v23 }
  0x59   : > { %v262_v45 = vsel %vm252_vm3, %v259_v37, %v261_v42  ;;  %v266_v46 = vsel %vm252_vm3, %v263_v38, %v265_v43  ;;  %v274_v51 = vmul.u32 %v267_v29, %v258_v44  ;;  %vm456_vm9 = vcmp.eq.s32.totalorder %v433_v20, 4 }
  0x5a   : > { %v952_v47 = vmul.u32.u64.low %v267_v29, %v266_v46  ;;  %v953_v48 = vmul.u32.u64.high %v267_v29, %v266_v46, %v952_v47  ;;  %v955_v49 = vmul.u32.u64.low %v267_v29, %v262_v45  ;;  %v956_v50 = vmul.u32.u64.high %v267_v29, %v262_v45, %v955_v49 }
  0x5b   : > { %vm462_vm10 = vcmp.eq.s32.totalorder %v433_v20, 1  ;;  %v614_v27 = vsel %vm456_vm9, 1.0, %v792_v26  ;;  %v445_v31 = vadd.s32 8, %v433_v20  ;;  %v434_v32 = vsub.s32 0, %v433_v20 }
  0x5c   : > { %vm276_vm5 = vc.u32 %v953_v48, %v955_v49  ;;  %v277_v52 = vadd.s32 1, %v956_v50  ;;  %v275_v63 = vadd.s32 %v955_v49, %v953_v48  ;;  %v615_v30 = vsel %vm462_vm10, 1.0, %v792_v26 }
  0x5d   : > { %v431_v33 = vmul.f32 %v612_v25, %v430_v3  ;;  %v437_v34 = vstv %s967_s13  ;;  %vm446_vm11 = vcmp.eq.s32.totalorder %v433_v20, 0  ;;  %vm448_vm12 = vcmp.eq.s32.totalorder %v433_v20, 5 }
  0x5e   : > { %v278_v53 = vsel %vm276_vm5, %v277_v52, %v956_v50  ;;  %v441_v35 = vsub.s32 1, %v433_v20  ;;  %v468_v36 = vsub.f32 %v614_v27, %v615_v30  ;;  %vm470_vm13 = vcmp.eq.s32.totalorder %v433_v20, 3  ;;  %vm450_vm5 = vmor %vm446_vm11, %vm448_vm12 }
  0x5f   : > { %v279_v54 = vadd.s32 %v278_v53, %v274_v51  ;;  %vm476_vm14 = vcmp.eq.s32.totalorder %v433_v20, 7  ;;  %vm483_vm1 = vcmp.eq.s32.totalorder %v445_v31, 10  ;;  %vm485_vm2 = vcmp.eq.s32.totalorder %v445_v31, 15 }
  0x60   : > { %v438_v40 = vmul.f32 %v612_v25, %v437_v34  ;;  %v435_v42 = vrot.slane %v431_v33, %v434_v32  ;;  %v616_v45 = vsel %vm470_vm13, 1.0, %v792_v26  ;;  %vm487_vm9 = vmor %vm483_vm1, %vm485_vm2  ;;  %v613_v48 = vsel %vm450_vm5, 1.0, %v792_v26 }
  0x61   : > { %v280_v55 = vadd.s32 536870912, %v279_v54  ;;  %v617_v52 = vsel %vm476_vm14, 1.0, %v792_v26 }
  0x62   : > { %v442_v51 = vrot.slane %v438_v40, %v441_v35 }
  0x63   : > { %v281_v56 = vshrl.u32 %v280_v55, 30  ;;  %v618_v55 = vsel %vm487_vm9, 1.0, %v792_v26 }
  0x65   : > { %v282_v57 = vshll.u32 %v281_v56, 30  ;;  %v305_v13 = vsub.s32 4, %v281_v56 }
  0x67   : > { %v283_v58 = vsub.s32 %v279_v54, %v282_v57  ;;  %v306_v17 = vsel %vm221_vm7, %v305_v13, %v281_v56 }
  0x68   : > { %v308_v22 = vsel %vm220_vm8, 0, %v306_v17 }
  0x69   : > { %v285_v59 = vsub.s32 0, %v283_v58  ;;  %v415_v24 = vadd.s32 3, %v308_v22  ;;  %v312_v28 = vand.u32 3, %v308_v22 }
  0x6b   : > { %v605_v60 = vmin.u32 %v285_v59, %v283_v58  ;;  %v416_v29 = vand.u32 3, %v415_v24  ;;  %vm317_vm15 = vcmp.eq.s32.totalorder %v312_v28, 2  ;;  %vm314_vm3 = vcmp.eq.s32.totalorder %v312_v28, 0 }
  0x6d   : > { %v287_v61 = vclz %v605_v60  ;;  %vm421_vm0 = vcmp.eq.s32.totalorder %v416_v29, 2  ;;  %vm418_vm4 = vcmp.eq.s32.totalorder %v416_v29, 0 }
  0x6f   : > { %v606_v62 = vadd.s32 4294967294, %v287_v61  ;;  %v504_v61 = vmul.f32 %v617_v52, %v442_v51 }
  0x71   : > { %vm607_vm6 = vcmp.lt.s32.totalorder %v606_v62, 0 }
  0x72   : > { %v290_v1 = vsel %vm607_vm6, 0, %v606_v62  ;;  %vm313_vm6 = vcmp.lt.s32.totalorder %v312_v28, 2 }
  0x73   : > { %v291_v2 = vsub.s32 32, %v290_v1  ;;  %v292_v4 = vshll.u32 %v283_v58, %v290_v1  ;;  %v295_v5 = vsub.s32 4294967266, %v290_v1 }
  0x75   : > { %v293_v6 = vshrl.u32 %v275_v63, %v291_v2  ;;  %v296_v7 = vadd.s32 127, %v295_v5  ;;  %v501_v63 = vmul.f32 0.0, %v435_v42 }
  0x77   : > { %v294_v8 = vor.u32 %v293_v6, %v292_v4  ;;  %v297_v9 = vshll.u32 %v296_v7, 23  ;;  %v505_v4 = vmul.f32 0.0, %v442_v51 }
  0x79   : > { %v298_v10 = vor.u32 4788187, %v297_v9  ;;  %v301_v11 = vcvt.s32.f32 %v294_v8 }
  0x7b   : > { %v299_v12 = vand.u32 2147483647, %v298_v10 }
  0x7d   : > { %v302_v14 = vmul.f32 %v301_v11, %v299_v12 }
  0x7f   : > { %v303_v16 = vxor.u32 2147483648, %v302_v14 }
  0x81   : > { %v304_v19 = vsel %vm221_vm7, %v303_v16, %v302_v14  ;;  %vm417_vm7 = vcmp.lt.s32.totalorder %v416_v29, 2 }
  0x82   : > { %v307_v21 = vsel %vm220_vm8, %v946_v0, %v304_v19  ;;  %vm311_vm8 = vweird.f32 %v946_v0  ;;  %v500_v0 = vmul.f32 %v616_v45, %v435_v42 }
  0x83   : > { %683 = vcosq.f32 %v307_v21 }
  0x84   : > { %685 = vsinq.f32 %v307_v21 }
  0x8d   : > { %v684_v37 = vpop.eup %683 }
  0x8e   : > { %v686_v38 = vpop.eup %685  ;;  %v318_v39 = vxor.u32 2147483648, %v684_v37 }
  0x8f   : > { %v315_v41 = vxor.u32 2147483648, %v686_v38 }
  0x90   : > { %v319_v43 = vsel %vm317_vm15, %v318_v39, %v686_v38  ;;  %v423_v44 = vsel %vm421_vm0, %v318_v39, %v686_v38 }
  0x91   : > { %v316_v46 = vsel %vm314_vm3, %v684_v37, %v315_v41  ;;  %v420_v47 = vsel %vm418_vm4, %v684_v37, %v315_v41 }
  0x92   : > { %v320_v49 = vsel %vm313_vm6, %v316_v46, %v319_v43  ;;  %v424_v50 = vsel %vm417_vm7, %v420_v47, %v423_v44 }
  0x93   : > { %v321_v53 = vsel %vm311_vm8, nan, %v320_v49  ;;  %v425_v54 = vsel %vm311_vm8, nan, %v424_v50 }
  0x94   : > { %v492_v56 = vmul.f32 %v613_v48, %v321_v53  ;;  %v496_v57 = vmul.f32 %v468_v36, %v425_v54  ;;  %v493_v58 = vmul.f32 0.0, %v321_v53  ;;  %v497_v59 = vmul.f32 0.0, %v425_v54 }
  0x96   : > { %v498_v60 = vadd.f32 %v496_v57, %v492_v56  ;;  %v495_v62 = vadd.f32 %v618_v55, %v493_v58 }
  0x98   : > { %v502_v1 = vadd.f32 %v500_v0, %v498_v60  ;;  %v499_v2 = vadd.f32 %v497_v59, %v495_v62 }
  0x9a   : > { %v506_v5 = vadd.f32 %v504_v61, %v502_v1  ;;  %v503_v6 = vadd.f32 %v501_v63, %v499_v2 }
  0x9c   : > { %508 = vst [vmem:[%s215_s15] sm:$0xff] %v506_v5  ;;  %v507_v7 = vadd.f32 %v505_v4, %v503_v6 }
  0x9e   : > { %509 = vst [vmem:[%s215_s15 + $0x8] sm:$0xff] %v507_v7 }
  0x9f   : > { %730 = shalt.err (!%p727_p4)
}
  0xa0   : > { %s731_s6 = scalar_lea.hbm %s984_s20, 256  ;;  %s735_s10 = scalar_lea.hbm %s1032_s4, 512 }
  0xa1   : > { %p732_p5 = scmp.ne.s32.totalorder %s984_s20, %s731_s6  ;;  %p736_p0 = scmp.lt.u32.totalorder %s984_s20, %s1032_s4 }
  0xa2   : > { %p737_p1 = scmp.lt.u32.totalorder %s735_s10, %s731_s6  ;;  %p739_p6 = scmp.lt.u32.totalorder %s731_s6, %s984_s20 }
  0xa3   : > { %p733_p8 = pnand %p732_p5, %p1041_p11 }
  0xa4   : > { %p738_p3 = por %p737_p1, %p736_p0 }
  0xa5   : > { %p734_p9 = pneg %p733_p8 }
  0xa6   : > { %p740_p12 = por %p739_p6, %p738_p3 }
  0xa8   : > { %p741_p13 = pnand %p740_p12, %p734_p9 }
  0xaa   : > { %744 = shalt.err (!%p741_p13)
}
  0xab   : > { %s794_s29 = smov 128   ;;  %s795_s13 = smov 256  }
  0xac   : > { %s796_s14 = smov 8  }
  0xad   : > { %629 = dma.vmem_to_hbm [thread:$0]  (%p1041_p11), %s979_s16, 256, %s984_s20, %s511_s1, %s794_s29, %s795_s13, %s796_s14  }
  0xae PF: > { %s538_s15 = sand.u32 1, %s771_s21   ;;  %p1042_p7 = scmp.ne.s32.totalorder %s1037_s5, 0 }
  0xaf   : > { %p1043_p10 = scmp.ge.s32.totalorder %s783_s24, 2  ;;  %s539_s17 = scalar_lea.sflag [#allocation7], %s538_s15 }
  0xb1   : > { %p636_p2 = pnand %p1043_p10, %p1042_p7 }
  0xb3   : > { %766 = dma.done.wait (!%p636_p2), %s539_s17, 256  }
  0xb4   : > { %768 = vsyncadd (!%p636_p2), %s539_s17, 4294967040  ;;  %p20_p4 = scmp.ge.s32.totalorder %s856_s2, 4   ;;  %s1044_s21 = smov %s775_s22 }
  0xb5   : > { %s1045_s22 = smov %s779_s23  ;;  %s1046_s23 = smov %s868_s27 }
  0xb6   : > { %s1047_s24 = smov %s856_s2  ;;  %22 = sbr.rel (!%p20_p4) target bundleno = 9 (0x9), region = 81 }
  0xbd   :  { %544 = vsyncpa [#allocation6], 1 }
  0xbe   :  { %546 = vsyncpa [#allocation6 + $0x1], 1 }
  0xbf   :  { %547 = vsyncpa [#allocation7], 1 }
  0xc0   :  { %549 = vsyncpa [#allocation7 + $0x1], 1 }

</bundles_post_ra>
